<compile_context>
chip_gen: v7x
topology: tpu7x:2x2x1
jax: 0.10.0
libtpu: 0.0.40
codegen_flags: <defaults>
</compile_context>

<pallas_src>
import functools

import jax
import jax.numpy as jnp
from jax.experimental import pallas as pl
from jax.experimental.pallas import tpu as pltpu


def _round_up(x, m):
    return (x + m - 1) // m * m


def _defconv2_kernel(x_ref, w_ref, b_ref, o_ref, *,
                     shifts, offsets, T, t_tile, c_out_pad):
    # x_ref: (1, 1, C_in, t_tile + halo)   halo'd per-(batch, time-tile) window
    # w_ref: (K, C_out_pad, C_in)          resident (constant index_map)
    # b_ref: (C_out_pad, K)                resident, f32
    # o_ref: (1, C_out_pad, t_tile)        lane-dense output tile
    xh = x_ref[0, 0]                                       # (C_in, win)
    t0 = pl.program_id(1) * t_tile                         # global start of this time tile
    t_idx = jax.lax.broadcasted_iota(jnp.int32, (c_out_pad, t_tile), 1) + t0

    acc = jnp.zeros((c_out_pad, t_tile), jnp.float32)
    for i, (s, off) in enumerate(zip(shifts, offsets)):    # K static taps, unrolled
        xs = xh[:, off:off + t_tile]                       # static lane-offset slice
        # MXU is massively under-utilized and the kernel is HBM-bound, so
        # HIGHEST precision is free; accumulate in f32.
        acc = acc + jnp.dot(w_ref[i], xs,
                            preferred_element_type=jnp.float32,
                            precision=jax.lax.Precision.HIGHEST)
        # Bias of tap i contributes only where 0 <= t - s_i < T  <=>  s_i <= t < T + s_i.
        mask = ((t_idx >= s) & (t_idx < T + s)).astype(jnp.float32)
        acc = acc + b_ref[:, i:i + 1] * mask                # VPU select-add (slack)
    o_ref[0] = acc.astype(o_ref.dtype)


def defconv2_forward(x, weights, biases, *, left_kernel=5, latency=2, dilation=2,
                     vmem_limit_bytes=32 * 1024 * 1024):
    """x: (B, C_in, T); weights: (K, C_out, C_in); biases: (K, C_out)."""
    B, c_in, T = x.shape
    K, c_out, _ = weights.shape
    shifts = [-latency] + [j * dilation for j in range(left_kernel)]
    assert K == len(shifts)
    pad_left = dilation * (left_kernel - 1)
    # The pad + mask formulation matches torch.roll semantics only while the
    # negative roll never wraps real (non-pad) data back into [0, T).
    assert latency <= pad_left, (
        "defconv2_forward requires latency <= dilation*(left_kernel-1)")
    halo = pad_left + latency
    offsets = [pad_left - s for s in shifts]               # each in [0, halo]

    itemsize = jnp.dtype(x.dtype).itemsize
    sublane = 8 if itemsize >= 4 else 16                   # bf16 packs 16 rows/vreg
    c_out_pad = _round_up(c_out, sublane)

    # ---- time-tile size from an explicit VMEM budget (valid on v5e/v6e/v7x) ----
    per_lane = (2 * itemsize * (c_in + c_out_pad)          # double-buffered in/out
                + 4 * (K * c_in + 2 * c_out_pad))          # f32 in-kernel temporaries
    budget = min(20 * 1024 * 1024, vmem_limit_bytes - 4 * 1024 * 1024)
    max_tile = (budget // per_lane) // 128 * 128
    assert max_tile >= 128, (
        "channel count too large for a 128-lane time tile within the VMEM budget")
    t_tile = min(_round_up(T, 128), 8192, max_tile)
    if B == 1:
        # v7x megacore: keep >=2 parallel grid steps when there is only one batch.
        t_tile = min(t_tile, max(128, _round_up(pl.cdiv(T, 2), 128)))
    T_pad = _round_up(T, t_tile)
    n_t = T_pad // t_tile

    # ---- wrapper-side plumbing: ONE pad of x (no K-fold im2col, no bias slab) ----
    # Real data lives at time indices [pad_left, pad_left + T); everything else is 0.
    xp = jnp.pad(x, ((0, 0), (0, 0), (pad_left, (T_pad - T) + latency)))
    win = t_tile + halo
    if n_t == 1:
        xw = xp[:, None]                                   # (B, 1, C_in, win)
    else:
        # Halo'd windows: ~halo/t_tile duplication (tiny) vs the old 6x im2col.
        xw = jnp.stack([xp[:, :, j * t_tile:j * t_tile + win] for j in range(n_t)],
                       axis=1)                             # (B, n_t, C_in, win)

    wp = jnp.pad(weights, ((0, 0), (0, c_out_pad - c_out), (0, 0))).astype(x.dtype)
    b2 = jnp.pad(biases, ((0, 0), (0, c_out_pad - c_out))).astype(jnp.float32).T  # (C_out_pad, K)

    kernel = functools.partial(
        _defconv2_kernel, shifts=tuple(shifts), offsets=tuple(offsets),
        T=T, t_tile=t_tile, c_out_pad=c_out_pad)

    out = pl.pallas_call(
        kernel,
        out_shape=jax.ShapeDtypeStruct((B, c_out_pad, T_pad), x.dtype),
        grid_spec=pltpu.PrefetchScalarGridSpec(
            num_scalar_prefetch=0,
            grid=(B, n_t),
            in_specs=[
                pl.BlockSpec((1, 1, c_in, win), lambda b, j: (b, j, 0, 0)),
                pl.BlockSpec((K, c_out_pad, c_in), lambda b, j: (0, 0, 0)),
                pl.BlockSpec((c_out_pad, K), lambda b, j: (0, 0)),
            ],
            out_specs=pl.BlockSpec((1, c_out_pad, t_tile), lambda b, j: (b, 0, j)),
        ),
        compiler_params=pltpu.CompilerParams(
            dimension_semantics=("parallel", "parallel"),
            vmem_limit_bytes=vmem_limit_bytes),
    )(xw, wp, b2)

    # Un-pad; output is already in PyTorch (B, C_out, T) layout.
    return out[:, :c_out, :T]


def defconv2_reference(x, weights, biases, *, left_kernel=5, latency=2, dilation=2):
    """Pure-JAX transliteration of the PyTorch forward (pad + roll + sum)."""
    B, _, T = x.shape
    shifts = [-latency] + [j * dilation for j in range(left_kernel)]
    pad = dilation * (left_kernel - 1)
    acc = jnp.zeros((B, weights.shape[1], T + pad), x.dtype)
    for i, s in enumerate(shifts):
        conv = jnp.einsum("oc,bct->bot", weights[i], x,
                          precision=jax.lax.Precision.HIGHEST)
        conv = conv + biases[i][None, :, None]
        feat = jnp.pad(conv, ((0, 0), (0, 0), (0, pad)))
        acc = acc + jnp.roll(feat, s, axis=-1)
    return acc[:, :, :T]


if __name__ == "__main__":
    # defConv2(in_channels=4, out_channels=4, left_kernel=5, latency=2, dilation=2)
    # (the module's forward requires out_channels == in_channels to type-check).
    B, C, T = 2, 4, 16
    left_kernel, latency, dilation = 5, 2, 2
    K = left_kernel + 1

    key = jax.random.PRNGKey(0)
    k1, k2, k3 = jax.random.split(key, 3)
    x = jax.random.normal(k1, (B, C, T), jnp.float32)
    # nn.Conv1d(C, C, kernel_size=1, bias=True) weights: (out, in, 1) -> (out, in)
    weights = 0.5 * jax.random.normal(k2, (K, C, C), jnp.float32)
    biases = 0.1 * jax.random.normal(k3, (K, C), jnp.float32)

    y = defconv2_forward(x, weights, biases,
                         left_kernel=left_kernel, latency=latency, dilation=dilation)
    y = jax.block_until_ready(y)

    y_ref = defconv2_reference(x, weights, biases,
                               left_kernel=left_kernel, latency=latency, dilation=dilation)
    assert y.shape == (B, C, T)
    # Kernel dot runs at Precision.HIGHEST (free: MXU <2% utilized, HBM-bound),
    # so the tolerance is tight.
    assert jnp.allclose(y, y_ref, atol=1e-4, rtol=1e-4), \
        f"max abs err = {jnp.max(jnp.abs(y - y_ref))}"
    print("KERNEL_OK")
</pallas_src>

<mosaic_0001>
module attributes {stable_mosaic.version = 11 : i64} {
  func.func @_defconv2_kernel(%arg0: i32, %arg1: i32, %arg2: memref<1x1x4x138xf32, #tpu.memory_space<vmem>>, %arg3: memref<6x8x4xf32, #tpu.memory_space<vmem>>, %arg4: memref<8x6xf32, #tpu.memory_space<vmem>>, %arg5: memref<1x8x128xf32, #tpu.memory_space<vmem>>) attributes {dimension_semantics = [#tpu.dimension_semantics<parallel>, #tpu.dimension_semantics<parallel>], iteration_bounds = array<i64: 2, 1>, scalar_prefetch = 0 : i64, scratch_operands = 0 : i64, tpu.core_type = #tpu.core_type<tc>, window_params = [{transform_indices = @transform_0, window_bounds = array<i64: 1, 1, 4, 138>}, {pipeline_mode = #tpu.pipeline_mode<synchronous>, transform_indices = @transform_1, window_bounds = array<i64: 6, 8, 4>}, {pipeline_mode = #tpu.pipeline_mode<synchronous>, transform_indices = @transform_2, window_bounds = array<i64: 8, 6>}, {transform_indices = @transform_3, window_bounds = array<i64: 1, 8, 128>}]} {
    %c0 = arith.constant 0 : index
    %c0_0 = arith.constant 0 : index
    %c0_1 = arith.constant 0 : index
    %c0_2 = arith.constant 0 : index
    %0 = vector.load %arg2[%c0, %c0_0, %c0_1, %c0_2] : memref<1x1x4x138xf32, #tpu.memory_space<vmem>>, vector<1x1x4x138xf32>
    %1 = vector.shape_cast %0 : vector<1x1x4x138xf32> to vector<4x138xf32>
    %c128_i32 = arith.constant 128 : i32
    %2 = arith.muli %arg1, %c128_i32 : i32
    %3 = tpu.iota {dimensions = array<i32: 1>} : vector<8x128xi32>
    %4 = vector.broadcast %2 : i32 to vector<8x128xi32>
    %5 = arith.addi %3, %4 : vector<8x128xi32>
    %cst = arith.constant 0.000000e+00 : f32
    %6 = vector.broadcast %cst : f32 to vector<8x128xf32>
    %7 = vector.extract_strided_slice %1 {offsets = [0, 10], sizes = [4, 128], strides = [1, 1]} : vector<4x138xf32> to vector<4x128xf32>
    %c0_3 = arith.constant 0 : index
    %c0_4 = arith.constant 0 : index
    %c0_5 = arith.constant 0 : index
    %8 = vector.load %arg3[%c0_3, %c0_4, %c0_5] : memref<6x8x4xf32, #tpu.memory_space<vmem>>, vector<1x8x4xf32>
    %9 = vector.shape_cast %8 : vector<1x8x4xf32> to vector<8x4xf32>
    %cst_6 = arith.constant dense<0.000000e+00> : vector<8x128xf32>
    %10 = tpu.matmul %9, %7, %cst_6 {dimension_numbers = #tpu.dot_dimension_numbers<[1], [0], [0], [1], [0, 0, 1, 1], [], []>, precision = #tpu.contract_precision<fp32>} : vector<8x4xf32>, vector<4x128xf32>, vector<8x128xf32> -> vector<8x128xf32>
    %11 = arith.addf %6, %10 : vector<8x128xf32>
    %c-2_i32 = arith.constant -2 : i32
    %12 = vector.broadcast %c-2_i32 : i32 to vector<8x128xi32>
    %13 = arith.cmpi sge, %5, %12 : vector<8x128xi32>
    %c14_i32 = arith.constant 14 : i32
    %14 = vector.broadcast %c14_i32 : i32 to vector<8x128xi32>
    %15 = arith.cmpi slt, %5, %14 : vector<8x128xi32>
    %16 = arith.andi %13, %15 : vector<8x128xi1>
    %17 = arith.extui %16 : vector<8x128xi1> to vector<8x128xi32>
    %18 = arith.sitofp %17 : vector<8x128xi32> to vector<8x128xf32>
    %c0_7 = arith.constant 0 : index
    %c0_8 = arith.constant 0 : index
    %19 = vector.load %arg4[%c0_7, %c0_8] : memref<8x6xf32, #tpu.memory_space<vmem>>, vector<8x1xf32>
    %20 = vector.broadcast %19 : vector<8x1xf32> to vector<8x128xf32>
    %21 = arith.mulf %20, %18 : vector<8x128xf32>
    %22 = arith.addf %11, %21 : vector<8x128xf32>
    %23 = vector.extract_strided_slice %1 {offsets = [0, 8], sizes = [4, 128], strides = [1, 1]} : vector<4x138xf32> to vector<4x128xf32>
    %c1 = arith.constant 1 : index
    %c0_9 = arith.constant 0 : index
    %c0_10 = arith.constant 0 : index
    %24 = vector.load %arg3[%c1, %c0_9, %c0_10] : memref<6x8x4xf32, #tpu.memory_space<vmem>>, vector<1x8x4xf32>
    %25 = vector.shape_cast %24 : vector<1x8x4xf32> to vector<8x4xf32>
    %cst_11 = arith.constant dense<0.000000e+00> : vector<8x128xf32>
    %26 = tpu.matmul %25, %23, %cst_11 {dimension_numbers = #tpu.dot_dimension_numbers<[1], [0], [0], [1], [0, 0, 1, 1], [], []>, precision = #tpu.contract_precision<fp32>} : vector<8x4xf32>, vector<4x128xf32>, vector<8x128xf32> -> vector<8x128xf32>
    %27 = arith.addf %22, %26 : vector<8x128xf32>
    %c0_i32 = arith.constant 0 : i32
    %28 = vector.broadcast %c0_i32 : i32 to vector<8x128xi32>
    %29 = arith.cmpi sge, %5, %28 : vector<8x128xi32>
    %c16_i32 = arith.constant 16 : i32
    %30 = vector.broadcast %c16_i32 : i32 to vector<8x128xi32>
    %31 = arith.cmpi slt, %5, %30 : vector<8x128xi32>
    %32 = arith.andi %29, %31 : vector<8x128xi1>
    %33 = arith.extui %32 : vector<8x128xi1> to vector<8x128xi32>
    %34 = arith.sitofp %33 : vector<8x128xi32> to vector<8x128xf32>
    %c0_12 = arith.constant 0 : index
    %c1_13 = arith.constant 1 : index
    %35 = vector.load %arg4[%c0_12, %c1_13] : memref<8x6xf32, #tpu.memory_space<vmem>>, vector<8x1xf32>
    %36 = vector.broadcast %35 : vector<8x1xf32> to vector<8x128xf32>
    %37 = arith.mulf %36, %34 : vector<8x128xf32>
    %38 = arith.addf %27, %37 : vector<8x128xf32>
    %39 = vector.extract_strided_slice %1 {offsets = [0, 6], sizes = [4, 128], strides = [1, 1]} : vector<4x138xf32> to vector<4x128xf32>
    %c2 = arith.constant 2 : index
    %c0_14 = arith.constant 0 : index
    %c0_15 = arith.constant 0 : index
    %40 = vector.load %arg3[%c2, %c0_14, %c0_15] : memref<6x8x4xf32, #tpu.memory_space<vmem>>, vector<1x8x4xf32>
    %41 = vector.shape_cast %40 : vector<1x8x4xf32> to vector<8x4xf32>
    %cst_16 = arith.constant dense<0.000000e+00> : vector<8x128xf32>
    %42 = tpu.matmul %41, %39, %cst_16 {dimension_numbers = #tpu.dot_dimension_numbers<[1], [0], [0], [1], [0, 0, 1, 1], [], []>, precision = #tpu.contract_precision<fp32>} : vector<8x4xf32>, vector<4x128xf32>, vector<8x128xf32> -> vector<8x128xf32>
    %43 = arith.addf %38, %42 : vector<8x128xf32>
    %c2_i32 = arith.constant 2 : i32
    %44 = vector.broadcast %c2_i32 : i32 to vector<8x128xi32>
    %45 = arith.cmpi sge, %5, %44 : vector<8x128xi32>
    %c18_i32 = arith.constant 18 : i32
    %46 = vector.broadcast %c18_i32 : i32 to vector<8x128xi32>
    %47 = arith.cmpi slt, %5, %46 : vector<8x128xi32>
    %48 = arith.andi %45, %47 : vector<8x128xi1>
    %49 = arith.extui %48 : vector<8x128xi1> to vector<8x128xi32>
    %50 = arith.sitofp %49 : vector<8x128xi32> to vector<8x128xf32>
    %c0_17 = arith.constant 0 : index
    %c2_18 = arith.constant 2 : index
    %51 = vector.load %arg4[%c0_17, %c2_18] : memref<8x6xf32, #tpu.memory_space<vmem>>, vector<8x1xf32>
    %52 = vector.broadcast %51 : vector<8x1xf32> to vector<8x128xf32>
    %53 = arith.mulf %52, %50 : vector<8x128xf32>
    %54 = arith.addf %43, %53 : vector<8x128xf32>
    %55 = vector.extract_strided_slice %1 {offsets = [0, 4], sizes = [4, 128], strides = [1, 1]} : vector<4x138xf32> to vector<4x128xf32>
    %c3 = arith.constant 3 : index
    %c0_19 = arith.constant 0 : index
    %c0_20 = arith.constant 0 : index
    %56 = vector.load %arg3[%c3, %c0_19, %c0_20] : memref<6x8x4xf32, #tpu.memory_space<vmem>>, vector<1x8x4xf32>
    %57 = vector.shape_cast %56 : vector<1x8x4xf32> to vector<8x4xf32>
    %cst_21 = arith.constant dense<0.000000e+00> : vector<8x128xf32>
    %58 = tpu.matmul %57, %55, %cst_21 {dimension_numbers = #tpu.dot_dimension_numbers<[1], [0], [0], [1], [0, 0, 1, 1], [], []>, precision = #tpu.contract_precision<fp32>} : vector<8x4xf32>, vector<4x128xf32>, vector<8x128xf32> -> vector<8x128xf32>
    %59 = arith.addf %54, %58 : vector<8x128xf32>
    %c4_i32 = arith.constant 4 : i32
    %60 = vector.broadcast %c4_i32 : i32 to vector<8x128xi32>
    %61 = arith.cmpi sge, %5, %60 : vector<8x128xi32>
    %c20_i32 = arith.constant 20 : i32
    %62 = vector.broadcast %c20_i32 : i32 to vector<8x128xi32>
    %63 = arith.cmpi slt, %5, %62 : vector<8x128xi32>
    %64 = arith.andi %61, %63 : vector<8x128xi1>
    %65 = arith.extui %64 : vector<8x128xi1> to vector<8x128xi32>
    %66 = arith.sitofp %65 : vector<8x128xi32> to vector<8x128xf32>
    %c0_22 = arith.constant 0 : index
    %c3_23 = arith.constant 3 : index
    %67 = vector.load %arg4[%c0_22, %c3_23] : memref<8x6xf32, #tpu.memory_space<vmem>>, vector<8x1xf32>
    %68 = vector.broadcast %67 : vector<8x1xf32> to vector<8x128xf32>
    %69 = arith.mulf %68, %66 : vector<8x128xf32>
    %70 = arith.addf %59, %69 : vector<8x128xf32>
    %71 = vector.extract_strided_slice %1 {offsets = [0, 2], sizes = [4, 128], strides = [1, 1]} : vector<4x138xf32> to vector<4x128xf32>
    %c4 = arith.constant 4 : index
    %c0_24 = arith.constant 0 : index
    %c0_25 = arith.constant 0 : index
    %72 = vector.load %arg3[%c4, %c0_24, %c0_25] : memref<6x8x4xf32, #tpu.memory_space<vmem>>, vector<1x8x4xf32>
    %73 = vector.shape_cast %72 : vector<1x8x4xf32> to vector<8x4xf32>
    %cst_26 = arith.constant dense<0.000000e+00> : vector<8x128xf32>
    %74 = tpu.matmul %73, %71, %cst_26 {dimension_numbers = #tpu.dot_dimension_numbers<[1], [0], [0], [1], [0, 0, 1, 1], [], []>, precision = #tpu.contract_precision<fp32>} : vector<8x4xf32>, vector<4x128xf32>, vector<8x128xf32> -> vector<8x128xf32>
    %75 = arith.addf %70, %74 : vector<8x128xf32>
    %c6_i32 = arith.constant 6 : i32
    %76 = vector.broadcast %c6_i32 : i32 to vector<8x128xi32>
    %77 = arith.cmpi sge, %5, %76 : vector<8x128xi32>
    %c22_i32 = arith.constant 22 : i32
    %78 = vector.broadcast %c22_i32 : i32 to vector<8x128xi32>
    %79 = arith.cmpi slt, %5, %78 : vector<8x128xi32>
    %80 = arith.andi %77, %79 : vector<8x128xi1>
    %81 = arith.extui %80 : vector<8x128xi1> to vector<8x128xi32>
    %82 = arith.sitofp %81 : vector<8x128xi32> to vector<8x128xf32>
    %c0_27 = arith.constant 0 : index
    %c4_28 = arith.constant 4 : index
    %83 = vector.load %arg4[%c0_27, %c4_28] : memref<8x6xf32, #tpu.memory_space<vmem>>, vector<8x1xf32>
    %84 = vector.broadcast %83 : vector<8x1xf32> to vector<8x128xf32>
    %85 = arith.mulf %84, %82 : vector<8x128xf32>
    %86 = arith.addf %75, %85 : vector<8x128xf32>
    %87 = vector.extract_strided_slice %1 {offsets = [0, 0], sizes = [4, 128], strides = [1, 1]} : vector<4x138xf32> to vector<4x128xf32>
    %c5 = arith.constant 5 : index
    %c0_29 = arith.constant 0 : index
    %c0_30 = arith.constant 0 : index
    %88 = vector.load %arg3[%c5, %c0_29, %c0_30] : memref<6x8x4xf32, #tpu.memory_space<vmem>>, vector<1x8x4xf32>
    %89 = vector.shape_cast %88 : vector<1x8x4xf32> to vector<8x4xf32>
    %cst_31 = arith.constant dense<0.000000e+00> : vector<8x128xf32>
    %90 = tpu.matmul %89, %87, %cst_31 {dimension_numbers = #tpu.dot_dimension_numbers<[1], [0], [0], [1], [0, 0, 1, 1], [], []>, precision = #tpu.contract_precision<fp32>} : vector<8x4xf32>, vector<4x128xf32>, vector<8x128xf32> -> vector<8x128xf32>
    %91 = arith.addf %86, %90 : vector<8x128xf32>
    %c8_i32 = arith.constant 8 : i32
    %92 = vector.broadcast %c8_i32 : i32 to vector<8x128xi32>
    %93 = arith.cmpi sge, %5, %92 : vector<8x128xi32>
    %c24_i32 = arith.constant 24 : i32
    %94 = vector.broadcast %c24_i32 : i32 to vector<8x128xi32>
    %95 = arith.cmpi slt, %5, %94 : vector<8x128xi32>
    %96 = arith.andi %93, %95 : vector<8x128xi1>
    %97 = arith.extui %96 : vector<8x128xi1> to vector<8x128xi32>
    %98 = arith.sitofp %97 : vector<8x128xi32> to vector<8x128xf32>
    %c0_32 = arith.constant 0 : index
    %c5_33 = arith.constant 5 : index
    %99 = vector.load %arg4[%c0_32, %c5_33] : memref<8x6xf32, #tpu.memory_space<vmem>>, vector<8x1xf32>
    %100 = vector.broadcast %99 : vector<8x1xf32> to vector<8x128xf32>
    %101 = arith.mulf %100, %98 : vector<8x128xf32>
    %102 = arith.addf %91, %101 : vector<8x128xf32>
    %c0_34 = arith.constant 0 : index
    %c0_35 = arith.constant 0 : index
    %c0_36 = arith.constant 0 : index
    %103 = vector.load %arg5[%c0_34, %c0_35, %c0_36] : memref<1x8x128xf32, #tpu.memory_space<vmem>>, vector<1x8x128xf32>
    %104 = vector.shape_cast %103 : vector<1x8x128xf32> to vector<8x128xf32>
    %105 = vector.shape_cast %102 : vector<8x128xf32> to vector<1x8x128xf32>
    tpu.vector_store %arg5[%c0_34, %c0_35, %c0_36], %105 {strides = array<i32>} : memref<1x8x128xf32, #tpu.memory_space<vmem>>, vector<1x8x128xf32>,
    return
  }
  func.func @transform_0(%arg0: i32, %arg1: i32) -> (i32, i32, i32, i32) {
    %c0_i32 = arith.constant 0 : i32
    %c0_i32_0 = arith.constant 0 : i32
    %c0_i32_1 = arith.constant 0 : i32
    return %arg0, %arg1, %c0_i32, %c0_i32_0 : i32, i32, i32, i32
  }
  func.func @transform_1(%arg0: i32, %arg1: i32) -> (i32, i32, i32) {
    %c0_i32 = arith.constant 0 : i32
    %c0_i32_0 = arith.constant 0 : i32
    %c0_i32_1 = arith.constant 0 : i32
    %c0_i32_2 = arith.constant 0 : i32
    return %c0_i32, %c0_i32_0, %c0_i32_1 : i32, i32, i32
  }
  func.func @transform_2(%arg0: i32, %arg1: i32) -> (i32, i32) {
    %c0_i32 = arith.constant 0 : i32
    %c0_i32_0 = arith.constant 0 : i32
    %c0_i32_1 = arith.constant 0 : i32
    return %c0_i32, %c0_i32_0 : i32, i32
  }
  func.func @transform_3(%arg0: i32, %arg1: i32) -> (i32, i32, i32) {
    %c0_i32 = arith.constant 0 : i32
    %c0_i32_0 = arith.constant 0 : i32
    return %arg0, %c0_i32, %arg1 : i32, i32, i32
  }
}

</mosaic_0001>

<bundles_post_ra>
// kernel: tpu_custom_call.1
= control target key start
LH: loop header
LB: loop body
LE: loop exit
PB: predicated region body
PF: predicated region fallthrough
CT: control target
= control target key end

     0   :  { %8 = vsyncpa [#allocation3], 0  ;;  %s3966_s0 = inlined_call_operand.vmem [shape: f32[2,1,4,138], index: 0, kind: input, shape index: {}]   ;;  %s3967_s1 = inlined_call_operand.vmem [shape: f32[6,8,4], index: 1, kind: input, shape index: {}]   ;;  %s3968_s2 = inlined_call_operand.vmem [shape: f32[8,6], index: 2, kind: input, shape index: {}]   ;;  %s3969_s3 = inlined_call_operand.hbm [shape: f32[2,8,128], index: 3, kind: output, shape index: {}]  }
   0x1   :  { %10 = vsyncpa [#allocation3 + $0x1], 0  ;;  %s3593_s12 = smov 0   ;;  %s3595_s13 = smov 0  }
   0x2   :  { %s3597_s14 = smov 0   ;;  %s3599_s15 = smov 0  }
   0x3   :  { %s3601_s16 = smov 0   ;;  %s3603_s17 = smov 0  }
   0x4 LB: > { %s3127_s18 = sadd.s32 4294967295, %s3557_s17   ;;  %s3128_s19 = sadd.s32 4294967294, %s3557_s17   ;;  %s3557_s17 = sphi %s3603_s17, %s16_s17   ;;  %s3553_s16 = sphi %s3601_s16, %s3976_s16   ;;  %s3549_s15 = sphi %s3599_s15, %s3975_s15   ;;  %s3545_s14 = sphi %s3597_s14, %s3974_s14   ;;  %s3541_s13 = sphi %s3595_s13, %s3973_s13   ;;  %s3537_s12 = sphi %s3593_s12, %s3972_s12  }
   0x5   : > { %s28_s20 = sadd.s32 1, %s3553_s16  ;;  %s107_s21 = sadd.s32 1, %s3545_s14 }
   0x6   : > { %p30_p0 = scmp.ge.s32.totalorder %s28_s20, 2  ;;  %p117_p1 = scmp.ne.s32.totalorder %s3545_s14, %s3541_s13 }
   0x7   : > { %p118_p2 = scmp.eq.s32.totalorder %s3127_s18, 1  ;;  %p123_p3 = scmp.ne.s32.totalorder %s3541_s13, %s3537_s12 }
   0x8   : > { %s3978_s20 = smov (%p30_p0, %s28_s20), 0  ;;  %p124_p5 = scmp.eq.s32.totalorder %s3128_s19, 1 }
   0x9   : > { %p3633_p4 = por %p118_p2, %p117_p1  ;;  %s102_s23 = ssub.s32 %s3553_s16, %s3978_s20 }
   0xa   : > { %p3131_p6 = scmp.ge.s32.totalorder %s3557_s17, 1  ;;  %p105_p7 = scmp.eq.s32.totalorder %s102_s23, 0 }
   0xb   : > { %p3640_p8 = por %p124_p5, %p123_p3  ;;  %p160_p9 = scmp.lt.s32.totalorder %s3557_s17, 3 }
   0xc   : > { %s3646_s25 = scalar_select %p105_p7, %s3545_s14, %s107_s21  }
   0xd   : > { %p161_p10 = pnand %p3131_p6, %p160_p9 }
   0xe   : > { %p188_p11 = scmp.lt.s32.totalorder (!%p161_p10), %s3549_s15, 1  ;;  %v3559_v0 = vmov (!%p161_p10), 0.0   ;;  %vm3560_vm0 = vmmov (!%p161_p10), 0   ;;  %s3561_s4 = smov (!%p161_p10), 118   ;;  %v209_v3 = vld [vmem:[%s3968_s2] sm:$0xff] (!%p161_p10)  ;;  %v3566_v4 = vmov (!%p161_p10), 0  }
   0xf   : > { %164 = sbr.rel (%p161_p10) target bundleno = 459 (0x1cb), region = 32  ;;  %3223 = vmatprep.subr.mxu0 (!%p161_p10), %v3559_v0  ;;  %3228 = vmatprep.subr.mxu1 (!%p161_p10), %v3559_v0  ;;  %s3562_s5 = smov (!%p161_p10), 120   ;;  %v3567_v5 = vmov (!%p161_p10), 1   ;;  %v3568_v6 = vmov (!%p161_p10), 2   ;;  %v3569_v7 = vmov (!%p161_p10), 3   ;;  %v3570_v8 = vmov (!%p161_p10), 4  }
  0x10   : > { %3225 = vmatprep.mubr.msk.f32.mxu0 (!%p161_p10), %vm3560_vm0, %v3559_v0  ;;  %3230 = vmatprep.mubr.msk.f32.mxu1 (!%p161_p10), %vm3560_vm0, %v3559_v0  ;;  %s3563_s6 = smov (!%p161_p10), 122   ;;  %s3564_s7 = smov (!%p161_p10), 124   ;;  %v3571_v9 = vmov (!%p161_p10), 5   ;;  %v203_v10 = vld [vmem:[%s3967_s1] sm:$0xff] (!%p161_p10)  ;;  %vm224_vm1 = vcmask (!%p161_p10), 31744   ;;  %v3136_v14 = vld [vmem:[%s3967_s1 + $0x8] sm:$0xff] (!%p161_p10) }
  0x11   : > { %s3565_s8 = smov (!%p161_p10), 126   ;;  %3471 = vset.pattern.permute.xlu0 (!%p161_p10), %v3566_v4  ;;  %3472 = vset.pattern.permute.xlu1 (!%p161_p10), %v3567_v5  ;;  %v226_v11 = vsel (!%p161_p10), %vm224_vm1, %v203_v10, 0  ;;  %v686_v18 = vsel (!%p161_p10), %vm224_vm1, %v3136_v14, 0  ;;  %vm222_vm2 = vcmask (!%p161_p10), 965632   ;;  %vm683_vm3 = vcmask (!%p161_p10), 982016   ;;  %v3138_v32 = vld [vmem:[%s3967_s1 + $0x10] sm:$0xff] (!%p161_p10) }
  0x12   : > { %v3675_v12 = vand.u32 (!%p161_p10), 4294901760, %v226_v11  ;;  %vm228_vm4 = vcmask (!%p161_p10), 1043456   ;;  %v3682_v20 = vand.u32 (!%p161_p10), 4294901760, %v686_v18  ;;  %vm1156_vm5 = vcmask (!%p161_p10), 998400   ;;  %v3140_v50 = vld [vmem:[%s3967_s1 + $0x18] sm:$0xff] (!%p161_p10)  ;;  %v3142_v4 = vld [vmem:[%s3967_s1 + $0x20] sm:$0xff] (!%p161_p10) }
  0x13   : > { %v1159_v37 = vsel (!%p161_p10), %vm224_vm1, %v3138_v32, 0  ;;  %vm1629_vm6 = vcmask (!%p161_p10), 1014784   ;;  %v1632_v55 = vsel (!%p161_p10), %vm224_vm1, %v3140_v50, 0  ;;  %vm2102_vm7 = vcmask (!%p161_p10), 1031168  }
  0x14   : > { %v298_v13 = vsub.f32 (!%p161_p10), %v226_v11, %v3675_v12  ;;  %v3687_v29 = vsub.f32 (!%p161_p10), %v686_v18, %v3682_v20  ;;  %v3706_v43 = vand.u32 (!%p161_p10), 4294901760, %v1159_v37  ;;  %v3742_v60 = vand.u32 (!%p161_p10), 4294901760, %v1632_v55 }
  0x15   : > { %v2105_v10 = vsel (!%p161_p10), %vm224_vm1, %v3142_v4, 0 }
  0x16   : > { %s189_s26 = scalar_select %p188_p11, %s3549_s15, 1  ;;  %v299_v15 = vand.u32 4294901760, %v298_v13  ;;  %v758_v36 = vand.u32 4294901760, %v3687_v29  ;;  %v3716_v48 = vsub.f32 %v1159_v37, %v3706_v43  ;;  %v3786_v14 = vand.u32 4294901760, %v2105_v10 }
  0x18   : > { %s3150_s27 = sshll.u32 %s189_s26, 3  ;;  %v300_v19 = vsub.f32 %v298_v13, %v299_v15  ;;  %v759_v42 = vsub.f32 %v3687_v29, %v758_v36  ;;  %v1231_v54 = vand.u32 4294901760, %v3716_v48 }
  0x19   : > { %s196_s30 = scalar_lea.vmem %s3966_s0, %s3150_s27 }
  0x1a   : > { %v3659_v1 = vld [vmem:[%s196_s30] sm:$0xff]  ;;  %v301_v27 = vand.u32 4294901760, %v300_v19  ;;  %v760_v46 = vand.u32 4294901760, %v759_v42  ;;  %v1232_v59 = vsub.f32 %v3716_v48, %v1231_v54  ;;  %v3801_v19 = vsub.f32 %v2105_v10, %v3786_v14 }
  0x1b   : > { %218 = vrot.lane.b32.xlu0 %v3659_v1, %s3561_s4  ;;  %679 = vrot.lane.b32.xlu1 %v3659_v1, %s3562_s5  ;;  %v217_v2 = vcombine.high %v3659_v1, %v3659_v1 }
  0x1c   : > { %v1233_v62 = vand.u32 4294901760, %v1232_v59 }
  0x1f   : > { %220 = vrot.lane.b32.xlu0 %v217_v2, %s3561_s4  ;;  %681 = vrot.lane.b32.xlu1 %v217_v2, %s3562_s5 }
  0x23   : > { %1154 = vrot.lane.b32.xlu1 %v217_v2, %s3563_s6  ;;  %1152 = vrot.lane.b32.xlu0 %v3659_v1, %s3563_s6  ;;  %s185_s6 = sand.u32 1, %s3541_s13  }
  0x24   : > { %s3036_s21 = scalar_lea.sflag [#allocation3], %s185_s6 }
  0x27   : > { %1627 = vrot.lane.b32.xlu1 %v217_v2, %s3564_s7  ;;  %1625 = vrot.lane.b32.xlu0 %v3659_v1, %s3564_s7  ;;  %s3132_s7 = sshll.u32 %s185_s6, 3 }
  0x28   : > { %s187_s9 = scalar_lea.vmem [#allocation2], %s3132_s7 }
  0x29   : > { %s3050_s10 = sshll.u32 %s187_s9, 4  ;;  %s3921_s10 = int_to_ptr.vmem [resolvable:$true] %s3050_s10 }
  0x2a   : > { %s3479_s23 = scalar_lea.vmem %s3921_s10, 128 }
  0x2b   : > { %2100 = vrot.lane.b32.xlu1 %v217_v2, %s3565_s8  ;;  %2098 = vrot.lane.b32.xlu0 %v3659_v1, %s3565_s8  ;;  %s3147_s8 = sshll.u32 %s3549_s15, 7  ;;  %p3480_p12 = scmp.ne.s32.totalorder %s3921_s10, %s3479_s23 }
  0x2c   : > { %s3919_s19 = scalar_lea.hbm %s3969_s3, %s3147_s8  ;;  %s3572_s15 = smov [#allocation2]  }
  0x2d   : > { %p3481_p13 = pnand %p3480_p12, %p3633_p4  ;;  %s3483_s26 = sshll.u32 %s3572_s15, 4  ;;  %s3484_s26 = int_to_ptr.vmem [resolvable:$false] %s3483_s26 }
  0x2e   : > { %s3485_s27 = scalar_lea.vmem %s3484_s26, 256  ;;  %p3486_p1 = scmp.lt.s32.totalorder %s3921_s10, %s3484_s26 }
  0x2f   : > { %212 = vperm.xlu0 %3471, %v209_v3   ;;  %1145 = vperm.xlu1 %3472, %v209_v3   ;;  %p3482_p0 = pneg %p3481_p13  ;;  %p3487_p2 = scmp.lt.s32.totalorder %s3485_s27, %s3479_s23 }
  0x31   : > { %p3488_p3 = por %p3487_p2, %p3486_p1 }
  0x33   : > { %3473 = vset.pattern.permute.xlu1 %v3568_v6  ;;  %3474 = vset.pattern.permute.xlu0 %v3569_v7  ;;  %p3489_p5 = pnand %p3488_p3, %p3482_p0 }
  0x34   : > { %1618 = vperm.xlu1 %3473, %v209_v3   ;;  %2091 = vperm.xlu0 %3474, %v209_v3  }
  0x38   : > { %3475 = vset.pattern.permute.xlu1 %v3570_v8  ;;  %3477 = vset.pattern.permute.xlu0 %v3571_v9 }
  0x39   : > { %2564 = vperm.xlu1 %3475, %v209_v3  }
  0x3d   : > { %3476 = vset.pattern.permute.xlu1 %v3571_v9 }
  0x3e   : > { %3029 = vperm.xlu1 %3476, %v209_v3   ;;  %v3757_v3 = vsub.f32 %v1632_v55, %v3742_v60 }
  0x40   : > { %v1704_v9 = vand.u32 4294901760, %v3757_v3 }
  0x8d   : > { %v219_v16 = vpop.permute.xlu0 %218  ;;  %v680_v17 = vpop.permute.xlu1 %679 }
  0x91   : > { %v221_v21 = vpop.permute.xlu0 %220  ;;  %v682_v22 = vpop.permute.xlu1 %681 }
  0x92   : > { %v223_v23 = vsel %vm222_vm2, %v219_v16, %v221_v21  ;;  %v684_v24 = vsel %vm683_vm3, %v680_v17, %v682_v22 }
  0x93   : > { %v229_v25 = vsel %vm228_vm4, %v223_v23, 0  ;;  %v688_v26 = vsel %vm228_vm4, %v684_v24, 0  ;;  %v2177_v23 = vand.u32 4294901760, %v3801_v19 }
  0x94   : > { %v232_v28 = vand.u32 4294901760, %v229_v25  ;;  %v3689_v31 = vand.u32 4294901760, %v688_v26 }
  0x95   : > { %v1155_v33 = vpop.permute.xlu1 %1154  ;;  %v1153_v34 = vpop.permute.xlu0 %1152 }
  0x96   : > { %v309_v30 = vsub.f32 %v229_v25, %v232_v28  ;;  %3224 = vmatpush3.msra.mxu0 %v232_v28  ;;  %v768_v38 = vsub.f32 %v688_v26, %v3689_v31  ;;  %v1157_v40 = vsel %vm1156_vm5, %v1153_v34, %v1155_v33  ;;  %v2178_v26 = vsub.f32 %v3801_v19, %v2177_v23 }
  0x97   : > { %3226 = vmatmul.mubr.f32.vlgmr.msra.gmra.mrb[0].mxu0 %v301_v27  ;;  %3233 = vmatprep.subr.mxu0 %v3559_v0  ;;  %v1161_v44 = vsel %vm228_vm4, %v1157_v40, 0  ;;  %v2574_v27 = vsel %vm228_vm4, %v3659_v1, 0  ;;  %v199_v40 = vlaneseq }
  0x98   : > { %3234 = vmatpush3.msra.mxu0 %v309_v30  ;;  %3235 = vmatprep.mubr.msk.f32.mxu0 %vm3560_vm0, %v3559_v0  ;;  %v310_v35 = vand.u32 4294901760, %v309_v30  ;;  %v769_v45 = vand.u32 4294901760, %v768_v38  ;;  %v3713_v47 = vand.u32 4294901760, %v1161_v44 }
  0x99   : > { %3243 = vmatprep.subr.mxu0 %v3559_v0  ;;  %v1628_v51 = vpop.permute.xlu1 %1627  ;;  %v1626_v52 = vpop.permute.xlu0 %1625 }
  0x9a   : > { %v311_v39 = vsub.f32 %v309_v30, %v310_v35  ;;  %v770_v49 = vsub.f32 %v768_v38, %v769_v45  ;;  %v1241_v53 = vsub.f32 %v1161_v44, %v3713_v47  ;;  %v1630_v57 = vsel %vm1629_vm6, %v1626_v52, %v1628_v51 }
  0x9b   : > { %3236 = vmatmul.mubr.f32.vlgmr.msra.gmra.mrb[2].mxu0 %v298_v13  ;;  %v1634_v61 = vsel %vm228_vm4, %v1630_v57, 0  ;;  %v1705_v13 = vsub.f32 %v3757_v3, %v1704_v9 }
  0x9c   : > { %3244 = vmatpush3.msra.mxu0 %v310_v35  ;;  %v312_v41 = vand.u32 4294901760, %v311_v39  ;;  %3245 = vmatprep.mubr.msk.f32.mxu0 %vm3560_vm0, %v3559_v0  ;;  %v771_v56 = vand.u32 4294901760, %v770_v49  ;;  %v1242_v58 = vand.u32 4294901760, %v1241_v53  ;;  %v3754_v63 = vand.u32 4294901760, %v1634_v61 }
  0x9d   : > { %3253 = vmatprep.subr.mxu0 %v3559_v0  ;;  %v2101_v5 = vpop.permute.xlu1 %2100  ;;  %v2099_v6 = vpop.permute.xlu0 %2098  ;;  %v1706_v16 = vand.u32 4294901760, %v1705_v13 }
  0x9e   : > { %3229 = vmatpush3.msra.mxu1 %v312_v41  ;;  %v1243_v2 = vsub.f32 %v1241_v53, %v1242_v58  ;;  %v1714_v7 = vsub.f32 %v1634_v61, %v3754_v63  ;;  %v2103_v11 = vsel %vm2102_vm7, %v2099_v6, %v2101_v5  ;;  %v3896_v41 = vand.u32 127, %v199_v40 }
  0x9f   : > { %3231 = vmatmul.mubr.f32.vlgmr.msra.gmra.mrb[0].mxu1 %v3675_v12  ;;  %3238 = vmatprep.subr.mxu1 %v3559_v0 }
  0xa0   : > { %3246 = vmatmul.mubr.f32.vlgmr.msra.gmra.mrb[4].mxu0 %v3675_v12  ;;  %3239 = vmatpush3.msra.mxu1 %v232_v28  ;;  %v1244_v8 = vand.u32 4294901760, %v1243_v2  ;;  %vm205_vm8 = vcmp.lt.s32.totalorder %v3896_v41, 14  ;;  %vm1138_vm9 = vcmp.lt.s32.totalorder %v3896_v41, 16  ;;  %vm1610_vm10 = vcmp.ge.s32.totalorder %v3896_v41, 2 }
  0xa1   : > { %3254 = vmatpush3.msra.mxu0 %v3689_v31  ;;  %3240 = vmatprep.mubr.msk.f32.mxu1 %vm3560_vm0, %v3559_v0  ;;  %v3135_v42 = vsel %vm205_vm8, 1.0, %v3559_v0  ;;  %vm1611_vm11 = vcmp.lt.s32.totalorder %v3896_v41, 18  ;;  %vm2083_vm13 = vcmp.ge.s32.totalorder %v3896_v41, 4  ;;  %vm2084_vm14 = vcmp.lt.s32.totalorder %v3896_v41, 20 }
  0xa2   : > { %3248 = vmatprep.subr.mxu1 %v3559_v0  ;;  %3255 = vmatprep.mubr.msk.f32.mxu0 %vm3560_vm0, %v3559_v0  ;;  %vm1612_vm12 = vmand %vm1610_vm10, %vm1611_vm11  ;;  %vm3023_vm3 = vcmp.ge.s32.totalorder %v3896_v41, 8 }
  0xa3   : > { %3263 = vmatprep.subr.mxu0 %v3559_v0  ;;  %3241 = vmatmul.mubr.f32.vlgmr.msra.gmra.mrb[2].mxu1 %v299_v15  ;;  %v2107_v15 = vsel %vm228_vm4, %v2103_v11, 0  ;;  %vm2085_vm15 = vmand %vm2083_vm13, %vm2084_vm14  ;;  %vm3024_vm4 = vcmp.lt.s32.totalorder %v3896_v41, 24 }
  0xa4   : > { %3249 = vmatpush3.msra.mxu1 %v232_v28  ;;  %3256 = vmatmul.mubr.f32.vlgmr.msra.gmra.mrb[6].mxu0 %v760_v46  ;;  %v3798_v17 = vand.u32 4294901760, %v2107_v15  ;;  %vm3025_vm5 = vmand %vm3023_vm3, %vm3024_vm4 }
  0xa5   : > { %3264 = vmatpush3.msra.mxu0 %v768_v38  ;;  %3250 = vmatprep.mubr.msk.f32.mxu1 %vm3560_vm0, %v3559_v0 }
  0xa6   : > { %3258 = vmatprep.subr.mxu1 %v3559_v0  ;;  %3265 = vmatprep.mubr.msk.f32.mxu0 %vm3560_vm0, %v3559_v0  ;;  %v2187_v21 = vsub.f32 %v2107_v15, %v3798_v17 }
  0xa7   : > { %3273 = vmatprep.subr.mxu0 %v3559_v0  ;;  %3251 = vmatmul.mubr.f32.vlgmr.msra.gmra.mrb[4].mxu1 %v3675_v12  ;;  %v1715_v12 = vand.u32 4294901760, %v1714_v7 }
  0xa8   : > { %3259 = vmatpush3.msra.mxu1 %v771_v56  ;;  %3266 = vmatmul.mubr.f32.vlgmr.msra.gmra.mrb[8].mxu0 %v3687_v29  ;;  %v2188_v25 = vand.u32 4294901760, %v2187_v21  ;;  %v2179_v29 = vand.u32 4294901760, %v2178_v26 }
  0xa9   : > { %3274 = vmatpush3.msra.mxu0 %v769_v45  ;;  %3260 = vmatprep.mubr.msk.f32.mxu1 %vm3560_vm0, %v3559_v0  ;;  %v1716_v18 = vsub.f32 %v1714_v7, %v1715_v12 }
  0xaa   : > { %3268 = vmatprep.subr.mxu1 %v3559_v0  ;;  %3275 = vmatprep.mubr.msk.f32.mxu0 %vm3560_vm0, %v3559_v0  ;;  %v2189_v30 = vsub.f32 %v2187_v21, %v2188_v25 }
  0xab   : > { %3261 = vmatmul.mubr.f32.vlgmr.msra.gmra.mrb[6].mxu1 %v3682_v20  ;;  %3283 = vmatprep.subr.mxu0 %v3559_v0  ;;  %v1717_v22 = vand.u32 4294901760, %v1716_v18 }
  0xac   : > { %3269 = vmatpush3.msra.mxu1 %v3689_v31  ;;  %3276 = vmatmul.mubr.f32.vlgmr.msra.gmra.mrb[10].mxu0 %v3682_v20  ;;  %v2190_v32 = vand.u32 4294901760, %v2189_v30 }
  0xad   : > { %3284 = vmatpush3.msra.mxu0 %v3713_v47  ;;  %3270 = vmatprep.mubr.msk.f32.mxu1 %vm3560_vm0, %v3559_v0 }
  0xae   : > { %3278 = vmatprep.subr.mxu1 %v3559_v0  ;;  %3285 = vmatprep.mubr.msk.f32.mxu0 %vm3560_vm0, %v3559_v0 }
  0xaf   : > { %3293 = vmatprep.subr.mxu0 %v3559_v0  ;;  %3271 = vmatmul.mubr.f32.vlgmr.msra.gmra.mrb[8].mxu1 %v758_v36 }
  0xb0   : > { %3279 = vmatpush3.msra.mxu1 %v3689_v31  ;;  %3286 = vmatmul.mubr.f32.vlgmr.msra.gmra.mrb[12].mxu0 %v1233_v62  ;;  %v2577_v31 = vand.u32 4294901760, %v2574_v27 }
  0xb1   : > { %3294 = vmatpush3.msra.mxu0 %v1241_v53  ;;  %3280 = vmatprep.mubr.msk.f32.mxu1 %vm3560_vm0, %v3559_v0 }
  0xb2   : > { %3288 = vmatprep.subr.mxu1 %v3559_v0  ;;  %3295 = vmatprep.mubr.msk.f32.mxu0 %vm3560_vm0, %v3559_v0  ;;  %v2654_v33 = vsub.f32 %v2574_v27, %v2577_v31  ;;  %v3137_v27 = vsel %vm1138_vm9, 1.0, %v3559_v0 }
  0xb3   : > { %3303 = vmatprep.subr.mxu0 %v3559_v0  ;;  %3281 = vmatmul.mubr.f32.vlgmr.msra.gmra.mrb[10].mxu1 %v3682_v20  ;;  %v3144_v20 = vld [vmem:[%s3967_s1 + $0x28] sm:$0xff] }
  0xb4   : > { %3289 = vmatpush3.msra.mxu1 %v1244_v8  ;;  %3296 = vmatmul.mubr.f32.vlgmr.msra.gmra.mrb[14].mxu0 %v3716_v48  ;;  %v2572_v24 = vsel %vm224_vm1, %v3144_v20, 0  ;;  %v2655_v35 = vand.u32 4294901760, %v2654_v33  ;;  %vm2557_vm1 = vcmp.lt.s32.totalorder %v3896_v41, 22 }
  0xb5   : > { %3304 = vmatpush3.msra.mxu0 %v1242_v58  ;;  %3290 = vmatprep.mubr.msk.f32.mxu1 %vm3560_vm0, %v3559_v0  ;;  %v3832_v28 = vand.u32 4294901760, %v2572_v24 }
  0xb6   : > { %3298 = vmatprep.subr.mxu1 %v3559_v0  ;;  %3305 = vmatprep.mubr.msk.f32.mxu0 %vm3560_vm0, %v3559_v0  ;;  %v2656_v37 = vsub.f32 %v2654_v33, %v2655_v35 }
  0xb7   : > { %3291 = vmatmul.mubr.f32.vlgmr.msra.gmra.mrb[12].mxu1 %v3706_v43  ;;  %3313 = vmatprep.subr.mxu0 %v3559_v0  ;;  %v2643_v1 = vsub.f32 %v2572_v24, %v3832_v28 }
  0xb8   : > { %3299 = vmatpush3.msra.mxu1 %v3713_v47  ;;  %3306 = vmatmul.mubr.f32.vlgmr.msra.gmra.mrb[16].mxu0 %v3706_v43  ;;  %v2657_v39 = vand.u32 4294901760, %v2656_v37 }
  0xb9   : > { %3314 = vmatpush3.msra.mxu0 %v3754_v63  ;;  %3300 = vmatprep.mubr.msk.f32.mxu1 %vm3560_vm0, %v3559_v0  ;;  %v2644_v34 = vand.u32 4294901760, %v2643_v1 }
  0xba   : > { %3308 = vmatprep.subr.mxu1 %v3559_v0  ;;  %3315 = vmatprep.mubr.msk.f32.mxu0 %vm3560_vm0, %v3559_v0 }
  0xbb   : > { %3323 = vmatprep.subr.mxu0 %v3559_v0  ;;  %3301 = vmatmul.mubr.f32.vlgmr.msra.gmra.mrb[14].mxu1 %v1231_v54  ;;  %v2645_v36 = vsub.f32 %v2643_v1, %v2644_v34 }
  0xbc   : > { %3309 = vmatpush3.msra.mxu1 %v3713_v47  ;;  %3316 = vmatmul.mubr.f32.vlgmr.msra.gmra.mrb[18].mxu0 %v1706_v16 }
  0xbd   : > { %3324 = vmatpush3.msra.mxu0 %v1714_v7  ;;  %3310 = vmatprep.mubr.msk.f32.mxu1 %vm3560_vm0, %v3559_v0  ;;  %v2646_v38 = vand.u32 4294901760, %v2645_v36 }
  0xbe   : > { %3318 = vmatprep.subr.mxu1 %v3559_v0  ;;  %3325 = vmatprep.mubr.msk.f32.mxu0 %vm3560_vm0, %v3559_v0 }
  0xbf   : > { %3333 = vmatprep.subr.mxu0 %v3559_v0  ;;  %3311 = vmatmul.mubr.f32.vlgmr.msra.gmra.mrb[16].mxu1 %v3706_v43  ;;  %v213_v43 = vpop.permute.xlu0 %212 }
  0xc0   : > { %3319 = vmatpush3.msra.mxu1 %v1717_v22  ;;  %3326 = vmatmul.mubr.f32.vlgmr.msra.gmra.mrb[20].mxu0 %v3757_v3  ;;  %v215_v45 = vmul.f32 %v3135_v42, %v213_v43 }
  0xc1   : > { %3334 = vmatpush3.msra.mxu0 %v1715_v12  ;;  %3320 = vmatprep.mubr.msk.f32.mxu1 %vm3560_vm0, %v3559_v0 }
  0xc2   : > { %3328 = vmatprep.subr.mxu1 %v3559_v0  ;;  %3335 = vmatprep.mubr.msk.f32.mxu0 %vm3560_vm0, %v3559_v0 }
  0xc3   : > { %3321 = vmatmul.mubr.f32.vlgmr.msra.gmra.mrb[18].mxu1 %v3742_v60  ;;  %3343 = vmatprep.subr.mxu0 %v3559_v0 }
  0xc4   : > { %3329 = vmatpush3.msra.mxu1 %v3754_v63  ;;  %3336 = vmatmul.mubr.f32.vlgmr.msra.gmra.mrb[22].mxu0 %v3742_v60 }
  0xc5   : > { %3344 = vmatpush3.msra.mxu0 %v3798_v17  ;;  %3330 = vmatprep.mubr.msk.f32.mxu1 %vm3560_vm0, %v3559_v0 }
  0xc6   : > { %3338 = vmatprep.subr.mxu1 %v3559_v0  ;;  %3345 = vmatprep.mubr.msk.f32.mxu0 %vm3560_vm0, %v3559_v0 }
  0xc7   : > { %3353 = vmatprep.subr.mxu0 %v3559_v0  ;;  %3331 = vmatmul.mubr.f32.vlgmr.msra.gmra.mrb[20].mxu1 %v1704_v9 }
  0xc8   : > { %3339 = vmatpush3.msra.mxu1 %v3754_v63  ;;  %3346 = vmatmul.mubr.f32.vlgmr.msra.gmra.mrb[24].mxu0 %v2179_v29 }
  0xc9   : > { %3354 = vmatpush3.msra.mxu0 %v2187_v21  ;;  %3340 = vmatprep.mubr.msk.f32.mxu1 %vm3560_vm0, %v3559_v0 }
  0xca   : > { %3348 = vmatprep.subr.mxu1 %v3559_v0  ;;  %3355 = vmatprep.mubr.msk.f32.mxu0 %vm3560_vm0, %v3559_v0 }
  0xcb   : > { %3363 = vmatprep.subr.mxu0 %v3559_v0  ;;  %3341 = vmatmul.mubr.f32.vlgmr.msra.gmra.mrb[22].mxu1 %v3742_v60 }
  0xcc   : > { %3349 = vmatpush3.msra.mxu1 %v2190_v32  ;;  %3356 = vmatmul.mubr.f32.vlgmr.msra.gmra.mrb[26].mxu0 %v3801_v19 }
  0xcd   : > { %3364 = vmatpush3.msra.mxu0 %v2188_v25  ;;  %3350 = vmatprep.mubr.msk.f32.mxu1 %vm3560_vm0, %v3559_v0 }
  0xce   : > { %3358 = vmatprep.subr.mxu1 %v3559_v0  ;;  %3365 = vmatprep.mubr.msk.f32.mxu0 %vm3560_vm0, %v3559_v0 }
  0xcf   : > { %3351 = vmatmul.mubr.f32.vlgmr.msra.gmra.mrb[24].mxu1 %v3786_v14  ;;  %3373 = vmatprep.subr.mxu0 %v3559_v0 }
  0xd0   : > { %3359 = vmatpush3.msra.mxu1 %v3798_v17  ;;  %3360 = vmatprep.mubr.msk.f32.mxu1 %vm3560_vm0, %v3559_v0 }
  0xd1   : > { %3368 = vmatprep.subr.mxu1 %v3559_v0  ;;  %3366 = vmatmul.mubr.f32.vlgmr.msra.gmra.mrb[28].mxu0 %v3786_v14 }
  0xd2   : > { %3374 = vmatpush3.msra.mxu0 %v2577_v31  ;;  %3375 = vmatprep.mubr.msk.f32.mxu0 %vm3560_vm0, %v3559_v0 }
  0xd3   : > { %3361 = vmatmul.mubr.f32.vlgmr.msra.gmra.mrb[26].mxu1 %v2177_v23  ;;  %3383 = vmatprep.subr.mxu0 %v3559_v0 }
  0xd4   : > { %3369 = vmatpush3.msra.mxu1 %v3798_v17  ;;  %3370 = vmatprep.mubr.msk.f32.mxu1 %vm3560_vm0, %v3559_v0 }
  0xd5   : > { %3378 = vmatprep.subr.mxu1 %v3559_v0  ;;  %3376 = vmatmul.mubr.f32.vlgmr.msra.gmra.mrb[30].mxu0 %v2646_v38 }
  0xd6   : > { %3384 = vmatpush3.msra.mxu0 %v2654_v33  ;;  %3385 = vmatprep.mubr.msk.f32.mxu0 %vm3560_vm0, %v3559_v0 }
  0xd7   : > { %3371 = vmatmul.mubr.f32.vlgmr.msra.gmra.mrb[28].mxu1 %v3786_v14  ;;  %3393 = vmatprep.subr.mxu0 %v3559_v0 }
  0xd8   : > { %3379 = vmatpush3.msra.mxu1 %v2657_v39  ;;  %3380 = vmatprep.mubr.msk.f32.mxu1 %vm3560_vm0, %v3559_v0 }
  0xd9   : > { %3388 = vmatprep.subr.mxu1 %v3559_v0  ;;  %3386 = vmatmul.mubr.f32.vlgmr.msra.gmra.mrb[32].mxu0 %v2643_v1 }
  0xda   : > { %3394 = vmatpush3.msra.mxu0 %v2655_v35  ;;  %3395 = vmatprep.mubr.msk.f32.mxu0 %vm3560_vm0, %v3559_v0 }
  0xdb   : > { %3381 = vmatmul.mubr.f32.vlgmr.msra.gmra.mrb[30].mxu1 %v3832_v28 }
  0xdc   : > { %3389 = vmatpush3.msra.mxu1 %v2577_v31  ;;  %3390 = vmatprep.mubr.msk.f32.mxu1 %vm3560_vm0, %v3559_v0 }
  0xdd   : > { %3398 = vmatprep.subr.mxu1 %v3559_v0  ;;  %3396 = vmatmul.mubr.f32.vlgmr.msra.gmra.mrb[34].mxu0 %v3832_v28 }
  0xdf   : > { %3391 = vmatmul.mubr.f32.vlgmr.msra.gmra.mrb[32].mxu1 %v2644_v34 }
  0xe0   : > { %3399 = vmatpush3.msra.mxu1 %v2577_v31  ;;  %3400 = vmatprep.mubr.msk.f32.mxu1 %vm3560_vm0, %v3559_v0  ;;  %vm2556_vm0 = vcmp.ge.s32.totalorder %v3896_v41, 6 }
  0xe1   : > { %vm2558_vm2 = vmand %vm2556_vm0, %vm2557_vm1 }
  0xe3   : > { %3401 = vmatmul.mubr.f32.vlgmr.msra.gmra.mrb[34].mxu1 %v3832_v28  ;;  %v1146_v28 = vpop.permute.xlu1 %1145 }
  0xe4   : > { %v1148_v1 = vmul.f32 %v3137_v27, %v1146_v28 }
 0x16a   : > { %v303_v44 = vpop.f32.mrb[0].mxu0 }
 0x16b   : > { %v3227_v46 = vpop.f32.mrb[1].mxu0  ;;  %v304_v48 = vadd.f32 %v303_v44, %v215_v45 }
 0x16e   : > { %v453_v47 = vpop.f32.mrb[2].mxu0 }
 0x16f   : > { %v3237_v49 = vpop.f32.mrb[3].mxu0 }
 0x170   : > { %v3139_v49 = vsel %vm1612_vm12, 1.0, %v3559_v0 }
 0x172   : > { %v379_v50 = vpop.f32.mrb[0].mxu1 }
 0x173   : > { %v380_v51 = vadd.f32 %v379_v50, %v304_v48  ;;  %v3232_v52 = vpop.f32.mrb[1].mxu1  ;;  %v601_v53 = vpop.f32.mrb[4].mxu0 }
 0x174   : > { %v3247_v54 = vpop.f32.mrb[5].mxu0  ;;  %v1619_v50 = vpop.permute.xlu1 %1618 }
 0x175   : > { %v454_v55 = vadd.f32 %v453_v47, %v380_v51  ;;  %v1621_v54 = vmul.f32 %v3139_v49, %v1619_v50 }
 0x176   : > { %v527_v56 = vpop.f32.mrb[2].mxu1 }
 0x177   : > { %v528_v57 = vadd.f32 %v527_v56, %v454_v55  ;;  %v3242_v58 = vpop.f32.mrb[3].mxu1  ;;  %v762_v59 = vpop.f32.mrb[6].mxu0 }
 0x178   : > { %v3257_v60 = vpop.f32.mrb[7].mxu0 }
 0x179   : > { %v602_v61 = vadd.f32 %v601_v53, %v528_v57 }
 0x17a   : > { %v673_v62 = vpop.f32.mrb[4].mxu1 }
 0x17b   : > { %v674_v63 = vadd.f32 %v673_v62, %v602_v61  ;;  %v3252_v2 = vpop.f32.mrb[5].mxu1  ;;  %v912_v3 = vpop.f32.mrb[8].mxu0 }
 0x17c   : > { %v3267_v4 = vpop.f32.mrb[9].mxu0 }
 0x17e   : > { %v838_v5 = vpop.f32.mrb[6].mxu1 }
 0x17f   : > { %v839_v6 = vadd.f32 %v838_v5, %v762_v59  ;;  %v3262_v7 = vpop.f32.mrb[7].mxu1  ;;  %v1060_v8 = vpop.f32.mrb[10].mxu0 }
 0x180   : > { %v3277_v9 = vpop.f32.mrb[11].mxu0 }
 0x181   : > { %v913_v10 = vadd.f32 %v912_v3, %v839_v6  ;;  %v2092_v9 = vpop.permute.xlu0 %2091 }
 0x182   : > { %v986_v11 = vpop.f32.mrb[8].mxu1 }
 0x183   : > { %v987_v12 = vadd.f32 %v986_v11, %v913_v10  ;;  %v3272_v13 = vpop.f32.mrb[9].mxu1  ;;  %v1235_v14 = vpop.f32.mrb[12].mxu0 }
 0x184   : > { %v3287_v15 = vpop.f32.mrb[13].mxu0 }
 0x185   : > { %v1061_v16 = vadd.f32 %v1060_v8, %v987_v12  ;;  %v3141_v8 = vsel %vm2085_vm15, 1.0, %v3559_v0 }
 0x186   : > { %v1132_v17 = vpop.f32.mrb[10].mxu1 }
 0x187   : > { %v1133_v18 = vadd.f32 %v1132_v17, %v1061_v16  ;;  %v3282_v19 = vpop.f32.mrb[11].mxu1  ;;  %v1385_v20 = vpop.f32.mrb[14].mxu0 }
 0x188   : > { %v3297_v21 = vpop.f32.mrb[15].mxu0 }
 0x189   : > { %v1136_v22 = vadd.f32 %v1133_v18, %v674_v63 }
 0x18a   : > { %v1311_v23 = vpop.f32.mrb[12].mxu1 }
 0x18b   : > { %v1312_v24 = vadd.f32 %v1311_v23, %v1235_v14  ;;  %v3292_v25 = vpop.f32.mrb[13].mxu1  ;;  %v1533_v26 = vpop.f32.mrb[16].mxu0  ;;  %v1149_v38 = vadd.f32 %v1148_v1, %v1136_v22  ;;  %v2094_v14 = vmul.f32 %v3141_v8, %v2092_v9 }
 0x18c   : > { %v3307_v29 = vpop.f32.mrb[17].mxu0 }
 0x18d   : > { %v1386_v30 = vadd.f32 %v1385_v20, %v1312_v24 }
 0x18e   : > { %v1459_v31 = vpop.f32.mrb[14].mxu1 }
 0x18f   : > { %v1460_v32 = vadd.f32 %v1459_v31, %v1386_v30  ;;  %v3302_v33 = vpop.f32.mrb[15].mxu1  ;;  %v1708_v34 = vpop.f32.mrb[18].mxu0  ;;  %v3143_v30 = vsel %vm2558_vm2, 1.0, %v3559_v0 }
 0x190   : > { %v3317_v35 = vpop.f32.mrb[19].mxu0  ;;  %v2565_v31 = vpop.permute.xlu1 %2564 }
 0x191   : > { %v1534_v36 = vadd.f32 %v1533_v26, %v1460_v32  ;;  %v2567_v35 = vmul.f32 %v3143_v30, %v2565_v31 }
 0x192   : > { %v1605_v37 = vpop.f32.mrb[16].mxu1 }
 0x193   : > { %v1606_v39 = vadd.f32 %v1605_v37, %v1534_v36  ;;  %v3312_v40 = vpop.f32.mrb[17].mxu1  ;;  %v1858_v42 = vpop.f32.mrb[20].mxu0 }
 0x194   : > { %v3327_v43 = vpop.f32.mrb[21].mxu0 }
 0x195   : > { %v1609_v44 = vadd.f32 %v1606_v39, %v1149_v38  ;;  %v3145_v38 = vsel %vm3025_vm5, 1.0, %v3559_v0  ;;  %v3030_v39 = vpop.permute.xlu1 %3029 }
 0x196   : > { %v1784_v45 = vpop.f32.mrb[18].mxu1 }
 0x197   : > { %v1785_v46 = vadd.f32 %v1784_v45, %v1708_v34  ;;  %v3322_v47 = vpop.f32.mrb[19].mxu1  ;;  %v2006_v48 = vpop.f32.mrb[22].mxu0  ;;  %v1622_v61 = vadd.f32 %v1621_v54, %v1609_v44  ;;  %v3032_v45 = vmul.f32 %v3145_v38, %v3030_v39 }
 0x198   : > { %v3337_v51 = vpop.f32.mrb[23].mxu0 }
 0x199   : > { %v1859_v52 = vadd.f32 %v1858_v42, %v1785_v46 }
 0x19a   : > { %v1932_v53 = vpop.f32.mrb[20].mxu1 }
 0x19b   : > { %v1933_v55 = vadd.f32 %v1932_v53, %v1859_v52  ;;  %v3332_v56 = vpop.f32.mrb[21].mxu1  ;;  %v2181_v57 = vpop.f32.mrb[24].mxu0 }
 0x19c   : > { %v3347_v58 = vpop.f32.mrb[25].mxu0 }
 0x19d   : > { %v2007_v59 = vadd.f32 %v2006_v48, %v1933_v55 }
 0x19e   : > { %v2078_v60 = vpop.f32.mrb[22].mxu1 }
 0x19f   : > { %v2079_v62 = vadd.f32 %v2078_v60, %v2007_v59  ;;  %v3342_v63 = vpop.f32.mrb[23].mxu1  ;;  %v2331_v2 = vpop.f32.mrb[26].mxu0 }
 0x1a0   : > { %v3357_v3 = vpop.f32.mrb[27].mxu0 }
 0x1a1   : > { %v2082_v4 = vadd.f32 %v2079_v62, %v1622_v61 }
 0x1a2   : > { %v2257_v5 = vpop.f32.mrb[24].mxu1 }
 0x1a3   : > { %v2258_v6 = vadd.f32 %v2257_v5, %v2181_v57  ;;  %v3352_v7 = vpop.f32.mrb[25].mxu1  ;;  %v2095_v21 = vadd.f32 %v2094_v14, %v2082_v4 }
 0x1a4   : > { %v2479_v10 = vpop.f32.mrb[28].mxu0 }
 0x1a5   : > { %v2332_v11 = vadd.f32 %v2331_v2, %v2258_v6  ;;  %v3367_v12 = vpop.f32.mrb[29].mxu0 }
 0x1a6   : > { %v2405_v13 = vpop.f32.mrb[26].mxu1 }
 0x1a7   : > { %v2406_v15 = vadd.f32 %v2405_v13, %v2332_v11  ;;  %v3362_v16 = vpop.f32.mrb[27].mxu1 }
 0x1a8   : > { %v2648_v17 = vpop.f32.mrb[30].mxu0 }
 0x1a9   : > { %v2480_v18 = vadd.f32 %v2479_v10, %v2406_v15  ;;  %v3377_v19 = vpop.f32.mrb[31].mxu0 }
 0x1aa   : > { %v2551_v20 = vpop.f32.mrb[28].mxu1 }
 0x1ab   : > { %v2552_v22 = vadd.f32 %v2551_v20, %v2480_v18  ;;  %v3372_v23 = vpop.f32.mrb[29].mxu1 }
 0x1ac   : > { %v2798_v24 = vpop.f32.mrb[32].mxu0 }
 0x1ad   : > { %v2555_v25 = vadd.f32 %v2552_v22, %v2095_v21  ;;  %v3387_v26 = vpop.f32.mrb[33].mxu0 }
 0x1ae   : > { %v2724_v27 = vpop.f32.mrb[30].mxu1 }
 0x1af   : > { %v2725_v28 = vadd.f32 %v2724_v27, %v2648_v17  ;;  %v3382_v29 = vpop.f32.mrb[31].mxu1  ;;  %v2568_v42 = vadd.f32 %v2567_v35, %v2555_v25 }
 0x1b0   : > { %v2946_v1 = vpop.f32.mrb[34].mxu0 }
 0x1b1   : > { %v2799_v32 = vadd.f32 %v2798_v24, %v2725_v28  ;;  %v3397_v33 = vpop.f32.mrb[35].mxu0 }
 0x1b2   : > { %v2872_v34 = vpop.f32.mrb[32].mxu1 }
 0x1b3   : > { %v2873_v36 = vadd.f32 %v2872_v34, %v2799_v32  ;;  %v3392_v37 = vpop.f32.mrb[33].mxu1 }
 0x1b5   : > { %v2947_v41 = vadd.f32 %v2946_v1, %v2873_v36 }
 0x1b6   : > { %v3018_v40 = vpop.f32.mrb[34].mxu1 }
 0x1b7   : > { %v3019_v43 = vadd.f32 %v3018_v40, %v2947_v41  ;;  %v3402_v44 = vpop.f32.mrb[35].mxu1 }
 0x1b9   : > { %v3022_v46 = vadd.f32 %v3019_v43, %v2568_v42 }
 0x1bb   : > { %v3033_v47 = vadd.f32 %v3032_v45, %v3022_v46 }
 0x1bd   : > { %3034 = vst [vmem:[%s187_s9] sm:$0xff] %v3033_v47 }
 0x1be   : > { %3492 = shalt.err (!%p3489_p5)
}
 0x1bf   : > { %s3493_s28 = scalar_lea.hbm %s3919_s19, 128  ;;  %s3497_s4 = scalar_lea.hbm %s3969_s3, 256 }
 0x1c0   : > { %p3494_p6 = scmp.ne.s32.totalorder %s3919_s19, %s3493_s28  ;;  %p3498_p10 = scmp.lt.u32.totalorder %s3919_s19, %s3969_s3 }
 0x1c1   : > { %p3499_p11 = scmp.lt.u32.totalorder %s3497_s4, %s3493_s28  ;;  %p3501_p13 = scmp.lt.u32.totalorder %s3493_s28, %s3919_s19 }
 0x1c2   : > { %p3495_p7 = pnand %p3494_p6, %p3633_p4 }
 0x1c3   : > { %p3500_p12 = por %p3499_p11, %p3498_p10 }
 0x1c4   : > { %p3496_p9 = pneg %p3495_p7 }
 0x1c5   : > { %p3502_p0 = por %p3501_p13, %p3500_p12 }
 0x1c7   : > { %p3503_p1 = pnand %p3502_p0, %p3496_p9 }
 0x1c9   : > { %3506 = shalt.err (!%p3503_p1)
}
 0x1ca   : > { %3403 = dma.vmem_to_hbm [thread:$0]  (%p3633_p4), %s3921_s10, 128, %s3919_s19, %s3036_s21  }
 0x1cb PF: > { %p3409_p2 = scmp.ge.s32.totalorder %s3557_s17, 2  ;;  %s3062_s7 = sand.u32 1, %s3537_s12  }
 0x1cc   : > { %s3063_s8 = scalar_lea.sflag [#allocation3], %s3062_s7 }
 0x1cd   : > { %p3406_p3 = pnand %p3409_p2, %p3640_p8 }
 0x1cf   : > { %3532 = dma.done.wait (!%p3406_p3), %s3063_s8, 128  }
 0x1d0   : > { %3534 = vsyncadd (!%p3406_p3), %s3063_s8, 4294967168  ;;  %s16_s17 = sadd.s32 1, %s3557_s17   ;;  %s3972_s12 = smov %s3541_s13 }
 0x1d1   : > { %p13_p5 = scmp.ge.s32.totalorder %s16_s17, 4   ;;  %s3973_s13 = smov %s3545_s14 }
 0x1d2   : > { %s3974_s14 = smov %s3646_s25  ;;  %s3975_s15 = smov %s3553_s16 }
 0x1d3   : > { %s3976_s16 = smov %s3978_s20  ;;  %15 = sbr.rel (!%p13_p5) target bundleno = 4 (0x4), region = 72 }
 0x1da   :  { %3068 = vsyncpa [#allocation3], 1 }
 0x1db   :  { %3070 = vsyncpa [#allocation3 + $0x1], 1 }

</bundles_post_ra>
